<compile_context>
chip_gen: v7x
topology: tpu7x:2x2x1
jax: 0.10.0
libtpu: 0.0.40
codegen_flags: <defaults>
</compile_context>

<pallas_src>
import jax
import jax.numpy as jnp
from jax.experimental import pallas as pl
from jax.experimental.pallas import tpu as pltpu

K_IN = 28 * 28          # 784 (legal as a full-extent last block dim)
H1, H2 = 512, 256
N_OUT = 10
N_PAD = 128             # lane-dense logits


def mlp_kernel(x_ref, w1_ref, b1_ref, w2_ref, b2_ref, w3_ref, b3_ref, o_ref):
    # layer1 + relu1 (bf16 MXU, f32 accumulate, f32 epilogue)
    h1 = jnp.dot(x_ref[...], w1_ref[...], preferred_element_type=jnp.float32)
    h1 = jnp.maximum(h1 + b1_ref[...], 0.0)
    # layer2 + relu2
    h2 = jnp.dot(h1.astype(jnp.bfloat16), w2_ref[...],
                 preferred_element_type=jnp.float32)
    h2 = jnp.maximum(h2 + b2_ref[...], 0.0)
    # layer3 (padded logits, no activation)
    out = jnp.dot(h2.astype(jnp.bfloat16), w3_ref[...],
                  preferred_element_type=jnp.float32)
    o_ref[...] = (out + b3_ref[...]).astype(o_ref.dtype)


def prepare_params(params_f32):
    """Cast PyTorch-equivalent f32 params for the kernel.

    w1: (784,512) bf16 (no K padding), w2: (512,256) bf16,
    w3: (256,10)->(256,128) bf16 (zero cols), b3: (1,10)->(1,128) f32 (zero cols).
    Biases stay f32 for the VPU epilogue. Zero logit padding keeps math exact.
    """
    w1, b1, w2, b2, w3, b3 = params_f32
    w1p = w1.astype(jnp.bfloat16)
    w2p = w2.astype(jnp.bfloat16)
    w3p = jnp.zeros((H2, N_PAD), jnp.bfloat16).at[:, :N_OUT].set(
        w3.astype(jnp.bfloat16))
    b3p = jnp.zeros((1, N_PAD), jnp.float32).at[:, :N_OUT].set(b3)
    return (w1p, b1.astype(jnp.float32), w2p, b2.astype(jnp.float32), w3p, b3p)


def _round_up(n, m):
    return (n + m - 1) // m * m


def simple_nn_forward(x_nchw, kernel_params, *, tm=512):
    """x_nchw: [B, 1, 28, 28]. Returns logits [B, 10] (f32)."""
    B = x_nchw.shape[0]
    x = x_nchw.reshape(B, K_IN)                       # nn.Flatten(start_dim=1)

    # Batch-tile selection:
    #  * small B: round up to the 16-row sublane granule (bf16) instead of 128
    #  * large B: cap at tm (default 512) and keep >= 2 grid steps so the
    #    "parallel" axis can shard across both v7x TensorCores
    tm_eff = min(tm, _round_up(B, 16))
    if B >= 256 and pl.cdiv(B, tm_eff) < 2:
        tm_eff = _round_up(pl.cdiv(B, 2), 16)
    n_tiles = pl.cdiv(B, tm_eff)
    b_pad = n_tiles * tm_eff

    # No extra HBM pass: just the bf16 cast, plus a pad only if B needs rounding.
    x_bf = x.astype(jnp.bfloat16)
    if b_pad != B:
        x_bf = jnp.pad(x_bf, ((0, b_pad - B), (0, 0)))

    w1, b1, w2, b2, w3, b3 = kernel_params

    # Constant block index across the grid -> single-buffer the residents.
    def resident(shape):
        return pl.BlockSpec(shape, lambda i: (0, 0),
                            pipeline_mode=pl.Buffered(1))

    flops = 2 * b_pad * (K_IN * H1 + H1 * H2 + H2 * N_PAD)
    bytes_accessed = (b_pad * K_IN * 2                      # x (bf16)
                      + (w1.size + w2.size + w3.size) * 2   # weights (bf16)
                      + (b1.size + b2.size + b3.size) * 4   # biases (f32)
                      + b_pad * N_PAD * 4)                  # output (f32)

    out_padded = pl.pallas_call(
        mlp_kernel,
        out_shape=jax.ShapeDtypeStruct((b_pad, N_PAD), jnp.float32),
        grid=(n_tiles,),
        in_specs=[
            pl.BlockSpec((tm_eff, K_IN), lambda i: (i, 0)),  # x tile (pipelined)
            resident((K_IN, H1)),                            # w1 (VMEM-resident)
            resident((1, H1)),                               # b1
            resident((H1, H2)),                              # w2
            resident((1, H2)),                               # b2
            resident((H2, N_PAD)),                           # w3
            resident((1, N_PAD)),                            # b3
        ],
        out_specs=pl.BlockSpec((tm_eff, N_PAD), lambda i: (i, 0)),
        compiler_params=pltpu.CompilerParams(
            dimension_semantics=("parallel",)),
        cost_estimate=pl.CostEstimate(flops=flops, transcendentals=0,
                                      bytes_accessed=bytes_accessed),
    )(x_bf, w1, b1, w2, b2, w3, b3)

    return out_padded[:B, :N_OUT]


def init_params(key):
    """Deterministic f32 init mimicking PyTorch Linear defaults:
    U(-1/sqrt(fan_in), 1/sqrt(fan_in)) for both weight and bias.
    Stored as (in, out) so the kernel computes x @ W."""
    dims = [(K_IN, H1), (H1, H2), (H2, N_OUT)]
    params = []
    for fan_in, fan_out in dims:
        key, kw, kb = jax.random.split(key, 3)
        bound = 1.0 / jnp.sqrt(float(fan_in))
        w = jax.random.uniform(kw, (fan_in, fan_out), jnp.float32, -bound, bound)
        b = jax.random.uniform(kb, (1, fan_out), jnp.float32, -bound, bound)
        params.extend([w, b])
    return tuple(params)


if __name__ == "__main__":
    key = jax.random.PRNGKey(0)
    key, kx = jax.random.split(key)

    # small batch, MNIST-shaped input (NCHW, as PyTorch would feed it)
    B = 8
    x = jax.random.normal(kx, (B, 1, 28, 28), jnp.float32)

    params_f32 = init_params(key)
    kernel_params = prepare_params(params_f32)

    out = simple_nn_forward(x, kernel_params)
    out = jax.block_until_ready(out)
    assert out.shape == (B, N_OUT)

    # reference check in plain f32 JAX (tolerance loosened for bf16 matmuls)
    w1, b1, w2, b2, w3, b3 = params_f32
    xf = x.reshape(B, -1)
    ref = jnp.maximum(xf @ w1 + b1, 0.0)
    ref = jnp.maximum(ref @ w2 + b2, 0.0)
    ref = ref @ w3 + b3
    assert jnp.allclose(out, ref, atol=5e-2, rtol=5e-2), (
        float(jnp.max(jnp.abs(out - ref))))

    print("KERNEL_OK")
</pallas_src>

<mosaic_0001>
module attributes {stable_mosaic.version = 11 : i64} {
  func.func @mlp_kernel(%arg0: i32, %arg1: memref<16x784xbf16, #tpu.memory_space<vmem>>, %arg2: memref<784x512xbf16, #tpu.memory_space<vmem>>, %arg3: memref<1x512xf32, #tpu.memory_space<vmem>>, %arg4: memref<512x256xbf16, #tpu.memory_space<vmem>>, %arg5: memref<1x256xf32, #tpu.memory_space<vmem>>, %arg6: memref<256x128xbf16, #tpu.memory_space<vmem>>, %arg7: memref<1x128xf32, #tpu.memory_space<vmem>>, %arg8: memref<16x128xf32, #tpu.memory_space<vmem>>) attributes {dimension_semantics = [#tpu.dimension_semantics<parallel>], iteration_bounds = array<i64: 1>, scalar_prefetch = 0 : i64, scratch_operands = 0 : i64, tpu.core_type = #tpu.core_type<tc>, window_params = [{transform_indices = @transform_0, window_bounds = array<i64: 16, 784>}, {pipeline_mode = #tpu.pipeline_mode<synchronous>, transform_indices = @transform_1, window_bounds = array<i64: 784, 512>}, {pipeline_mode = #tpu.pipeline_mode<synchronous>, transform_indices = @transform_2, window_bounds = array<i64: 1, 512>}, {pipeline_mode = #tpu.pipeline_mode<synchronous>, transform_indices = @transform_3, window_bounds = array<i64: 512, 256>}, {pipeline_mode = #tpu.pipeline_mode<synchronous>, transform_indices = @transform_4, window_bounds = array<i64: 1, 256>}, {pipeline_mode = #tpu.pipeline_mode<synchronous>, transform_indices = @transform_5, window_bounds = array<i64: 256, 128>}, {pipeline_mode = #tpu.pipeline_mode<synchronous>, transform_indices = @transform_6, window_bounds = array<i64: 1, 128>}, {transform_indices = @transform_7, window_bounds = array<i64: 16, 128>}]} {
    %c0 = arith.constant 0 : index
    %c0_0 = arith.constant 0 : index
    %0 = vector.load %arg1[%c0, %c0_0] : memref<16x784xbf16, #tpu.memory_space<vmem>>, vector<16x784xbf16>
    %c0_1 = arith.constant 0 : index
    %c0_2 = arith.constant 0 : index
    %1 = vector.load %arg2[%c0_1, %c0_2] : memref<784x512xbf16, #tpu.memory_space<vmem>>, vector<784x512xbf16>
    %cst = arith.constant dense<0.000000e+00> : vector<16x512xf32>
    %2 = tpu.matmul %0, %1, %cst {dimension_numbers = #tpu.dot_dimension_numbers<[1], [0], [0], [1], [0, 0, 1, 1], [], []>} : vector<16x784xbf16>, vector<784x512xbf16>, vector<16x512xf32> -> vector<16x512xf32>
    %c0_3 = arith.constant 0 : index
    %c0_4 = arith.constant 0 : index
    %3 = vector.load %arg3[%c0_3, %c0_4] : memref<1x512xf32, #tpu.memory_space<vmem>>, vector<1x512xf32>
    %4 = vector.broadcast %3 : vector<1x512xf32> to vector<16x512xf32>
    %5 = arith.addf %2, %4 : vector<16x512xf32>
    %cst_5 = arith.constant 0.000000e+00 : f32
    %6 = vector.broadcast %cst_5 : f32 to vector<16x512xf32>
    %7 = arith.maximumf %5, %6 : vector<16x512xf32>
    %8 = arith.truncf %7 : vector<16x512xf32> to vector<16x512xbf16>
    %c0_6 = arith.constant 0 : index
    %c0_7 = arith.constant 0 : index
    %9 = vector.load %arg4[%c0_6, %c0_7] : memref<512x256xbf16, #tpu.memory_space<vmem>>, vector<512x256xbf16>
    %cst_8 = arith.constant dense<0.000000e+00> : vector<16x256xf32>
    %10 = tpu.matmul %8, %9, %cst_8 {dimension_numbers = #tpu.dot_dimension_numbers<[1], [0], [0], [1], [0, 0, 1, 1], [], []>} : vector<16x512xbf16>, vector<512x256xbf16>, vector<16x256xf32> -> vector<16x256xf32>
    %c0_9 = arith.constant 0 : index
    %c0_10 = arith.constant 0 : index
    %11 = vector.load %arg5[%c0_9, %c0_10] : memref<1x256xf32, #tpu.memory_space<vmem>>, vector<1x256xf32>
    %12 = vector.broadcast %11 : vector<1x256xf32> to vector<16x256xf32>
    %13 = arith.addf %10, %12 : vector<16x256xf32>
    %cst_11 = arith.constant 0.000000e+00 : f32
    %14 = vector.broadcast %cst_11 : f32 to vector<16x256xf32>
    %15 = arith.maximumf %13, %14 : vector<16x256xf32>
    %16 = arith.truncf %15 : vector<16x256xf32> to vector<16x256xbf16>
    %c0_12 = arith.constant 0 : index
    %c0_13 = arith.constant 0 : index
    %17 = vector.load %arg6[%c0_12, %c0_13] : memref<256x128xbf16, #tpu.memory_space<vmem>>, vector<256x128xbf16>
    %cst_14 = arith.constant dense<0.000000e+00> : vector<16x128xf32>
    %18 = tpu.matmul %16, %17, %cst_14 {dimension_numbers = #tpu.dot_dimension_numbers<[1], [0], [0], [1], [0, 0, 1, 1], [], []>} : vector<16x256xbf16>, vector<256x128xbf16>, vector<16x128xf32> -> vector<16x128xf32>
    %c0_15 = arith.constant 0 : index
    %c0_16 = arith.constant 0 : index
    %19 = vector.load %arg7[%c0_15, %c0_16] : memref<1x128xf32, #tpu.memory_space<vmem>>, vector<1x128xf32>
    %20 = vector.broadcast %19 : vector<1x128xf32> to vector<16x128xf32>
    %21 = arith.addf %18, %20 : vector<16x128xf32>
    %c0_17 = arith.constant 0 : index
    %c0_18 = arith.constant 0 : index
    %22 = vector.load %arg8[%c0_17, %c0_18] : memref<16x128xf32, #tpu.memory_space<vmem>>, vector<16x128xf32>
    tpu.vector_store %arg8[%c0_17, %c0_18], %21 {strides = array<i32>} : memref<16x128xf32, #tpu.memory_space<vmem>>, vector<16x128xf32>,
    return
  }
  func.func @transform_0(%arg0: i32) -> (i32, i32) {
    %c0_i32 = arith.constant 0 : i32
    %c0_i32_0 = arith.constant 0 : i32
    return %arg0, %c0_i32 : i32, i32
  }
  func.func @transform_1(%arg0: i32) -> (i32, i32) {
    %c0_i32 = arith.constant 0 : i32
    %c0_i32_0 = arith.constant 0 : i32
    %c0_i32_1 = arith.constant 0 : i32
    return %c0_i32, %c0_i32_0 : i32, i32
  }
  func.func @transform_2(%arg0: i32) -> (i32, i32) {
    %c0_i32 = arith.constant 0 : i32
    %c0_i32_0 = arith.constant 0 : i32
    %c0_i32_1 = arith.constant 0 : i32
    return %c0_i32, %c0_i32_0 : i32, i32
  }
  func.func @transform_3(%arg0: i32) -> (i32, i32) {
    %c0_i32 = arith.constant 0 : i32
    %c0_i32_0 = arith.constant 0 : i32
    %c0_i32_1 = arith.constant 0 : i32
    return %c0_i32, %c0_i32_0 : i32, i32
  }
  func.func @transform_4(%arg0: i32) -> (i32, i32) {
    %c0_i32 = arith.constant 0 : i32
    %c0_i32_0 = arith.constant 0 : i32
    %c0_i32_1 = arith.constant 0 : i32
    return %c0_i32, %c0_i32_0 : i32, i32
  }
  func.func @transform_5(%arg0: i32) -> (i32, i32) {
    %c0_i32 = arith.constant 0 : i32
    %c0_i32_0 = arith.constant 0 : i32
    %c0_i32_1 = arith.constant 0 : i32
    return %c0_i32, %c0_i32_0 : i32, i32
  }
  func.func @transform_6(%arg0: i32) -> (i32, i32) {
    %c0_i32 = arith.constant 0 : i32
    %c0_i32_0 = arith.constant 0 : i32
    %c0_i32_1 = arith.constant 0 : i32
    return %c0_i32, %c0_i32_0 : i32, i32
  }
  func.func @transform_7(%arg0: i32) -> (i32, i32) {
    %c0_i32 = arith.constant 0 : i32
    %c0_i32_0 = arith.constant 0 : i32
    return %arg0, %c0_i32 : i32, i32
  }
}

</mosaic_0001>

<bundles_post_ra>
// kernel: tpu_custom_call.1
= control target key start
LH: loop header
LB: loop body
LE: loop exit
PB: predicated region body
PF: predicated region fallthrough
CT: control target
= control target key end

     0   :  { %12 = vsyncpa [#allocation3], 0  ;;  %s3446_s0 = inlined_call_operand.hbm [shape: bf16[16,784], index: 0, kind: input, shape index: {}]   ;;  %s3447_s1 = inlined_call_operand.hbm [shape: bf16[784,512], index: 1, kind: input, shape index: {}]   ;;  %s3448_s2 = inlined_call_operand.vmem [shape: f32[1,512], index: 2, kind: input, shape index: {}]   ;;  %s3449_s3 = inlined_call_operand.hbm [shape: bf16[512,256], index: 3, kind: input, shape index: {}]   ;;  %s3450_s4 = inlined_call_operand.vmem [shape: f32[1,256], index: 4, kind: input, shape index: {}]   ;;  %s3451_s5 = inlined_call_operand.hbm [shape: bf16[256,128], index: 5, kind: input, shape index: {}]   ;;  %s3452_s6 = inlined_call_operand.vmem [shape: f32[1,128], index: 6, kind: input, shape index: {}]   ;;  %s3453_s7 = inlined_call_operand.hbm [shape: f32[16,128], index: 7, kind: output, shape index: {}]  }
   0x1   :  { %13 = vsyncpa [#allocation6], 0 }
   0x2   :  { %14 = vsyncpa [#allocation9], 0 }
   0x3   :  { %15 = vsyncpa [#allocation4], 0  ;;  %s3265_s24 = smov [#allocation5]   ;;  %s3147_s28 = scalar_lea.hbm %s3447_s1, 25088 }
   0x4   :  { %s33_s25 = sshll.u32 %s3265_s24, 4  ;;  %p3148_p0 = scmp.ne.s32.totalorder %s3447_s1, %s3147_s28  ;;  %s34_s25 = int_to_ptr.vmem [resolvable:$true] %s33_s25 }
   0x5   :  { %p3151_p1 = scmp.lt.u32.totalorder %s3147_s28, %s3447_s1 }
   0x7   :  { %p3153_p2 = pnand %p3151_p1, %p3148_p0 }
   0x9   :  { %3156 = shalt.err (!%p3153_p2)
}
   0xa   :  { %s3157_s10 = scalar_lea.vmem %s34_s25, 25088  ;;  %p3162_p4 = scmp.lt.s32.totalorder %s34_s25, %s34_s25 }
   0xb   :  { %p3158_p3 = scmp.ne.s32.totalorder %s34_s25, %s3157_s10  ;;  %p3163_p5 = scmp.lt.s32.totalorder %s3157_s10, %s3157_s10 }
   0xd   :  { %p3164_p6 = por %p3163_p5, %p3162_p4 }
   0xf   :  { %p3165_p7 = pnand %p3164_p6, %p3158_p3 }
  0x11   :  { %3168 = shalt.err (!%p3165_p7)
}
  0x12   :  { %s3266_s11 = smov 256   ;;  %s3267_s12 = smov 16  }
  0x13   :  { %39 = dma.hbm_to_vmem [thread:$0]  %s3447_s1, 25088, %s34_s25, [#allocation6], %s3266_s11, %s3266_s11, %s3267_s12  }
  0x14   :  { %s3268_s15 = smov [#allocation2]   ;;  %s3169_s19 = scalar_lea.hbm %s3446_s0, 896 }
  0x15   :  { %s21_s16 = sshll.u32 %s3268_s15, 4  ;;  %p3170_p8 = scmp.ne.s32.totalorder %s3446_s0, %s3169_s19  ;;  %s22_s16 = int_to_ptr.vmem [resolvable:$true] %s21_s16 }
  0x16   :  { %p3173_p9 = scmp.lt.u32.totalorder %s3169_s19, %s3446_s0 }
  0x18   :  { %p3175_p10 = pnand %p3173_p9, %p3170_p8 }
  0x1a   :  { %3178 = shalt.err (!%p3175_p10)
}
  0x1b   :  { %s3179_s24 = scalar_lea.vmem %s22_s16, 896  ;;  %p3184_p12 = scmp.lt.s32.totalorder %s22_s16, %s22_s16 }
  0x1c   :  { %p3180_p11 = scmp.ne.s32.totalorder %s22_s16, %s3179_s24  ;;  %p3185_p13 = scmp.lt.s32.totalorder %s3179_s24, %s3179_s24 }
  0x1e   :  { %p3186_p0 = por %p3185_p13, %p3184_p12 }
  0x20   :  { %p3187_p1 = pnand %p3186_p0, %p3180_p11 }
  0x22   :  { %3190 = shalt.err (!%p3187_p1)
}
  0x23   :  { %s3269_s1 = smov 448   ;;  %s3270_s25 = smov 28  }
  0x24   :  { %27 = dma.hbm_to_vmem [thread:$0]  %s3446_s0, 896, %s22_s16, [#allocation3], %s3269_s1, %s3269_s1, %s3270_s25  }
  0x25   :  { %s3271_s28 = smov [#allocation7]   ;;  %s3191_s9 = scalar_lea.hbm %s3449_s3, 8192 }
  0x26   :  { %s47_s29 = sshll.u32 %s3271_s28, 4  ;;  %p3192_p2 = scmp.ne.s32.totalorder %s3449_s3, %s3191_s9  ;;  %s48_s29 = int_to_ptr.vmem [resolvable:$true] %s47_s29 }
  0x27   :  { %p3195_p3 = scmp.lt.u32.totalorder %s3191_s9, %s3449_s3 }
  0x29   :  { %p3197_p4 = pnand %p3195_p3, %p3192_p2 }
  0x2b   :  { %3200 = shalt.err (!%p3197_p4)
}
  0x2c   :  { %s3201_s14 = scalar_lea.vmem %s48_s29, 8192  ;;  %p3206_p6 = scmp.lt.s32.totalorder %s48_s29, %s48_s29 }
  0x2d   :  { %p3202_p5 = scmp.ne.s32.totalorder %s48_s29, %s3201_s14  ;;  %p3207_p7 = scmp.lt.s32.totalorder %s3201_s14, %s3201_s14 }
  0x2f   :  { %p3208_p8 = por %p3207_p7, %p3206_p6 }
  0x31   :  { %p3209_p9 = pnand %p3208_p8, %p3202_p5 }
  0x33   :  { %3212 = shalt.err (!%p3209_p9)
}
  0x34   :  { %s3272_s0 = smov 128   ;;  %s3273_s15 = smov 8  }
  0x35   :  { %53 = dma.hbm_to_vmem [thread:$0]  %s3449_s3, 8192, %s48_s29, [#allocation6], %s3272_s0, %s3272_s0, %s3273_s15  }
  0x36   :  { %s3274_s18 = smov [#allocation8]   ;;  %s3213_s22 = scalar_lea.hbm %s3451_s5, 2048 }
  0x37   :  { %s61_s19 = sshll.u32 %s3274_s18, 4  ;;  %p3214_p10 = scmp.ne.s32.totalorder %s3451_s5, %s3213_s22  ;;  %s62_s19 = int_to_ptr.vmem [resolvable:$true] %s61_s19 }
  0x38   :  { %p3217_p11 = scmp.lt.u32.totalorder %s3213_s22, %s3451_s5 }
  0x3a   :  { %p3219_p12 = pnand %p3217_p11, %p3214_p10 }
  0x3c   :  { %3222 = shalt.err (!%p3219_p12)
}
  0x3d   :  { %s3223_s26 = scalar_lea.vmem %s62_s19, 2048  ;;  %p3228_p0 = scmp.lt.s32.totalorder %s62_s19, %s62_s19 }
  0x3e   :  { %p3224_p13 = scmp.ne.s32.totalorder %s62_s19, %s3223_s26  ;;  %p3229_p1 = scmp.lt.s32.totalorder %s3223_s26, %s3223_s26 }
  0x40   :  { %p3230_p2 = por %p3229_p1, %p3228_p0 }
  0x42   :  { %p3231_p3 = pnand %p3230_p2, %p3224_p13 }
  0x44   :  { %3234 = shalt.err (!%p3231_p3)
}
  0x45   :  { %s3275_s3 = smov 64   ;;  %s3276_s27 = smov 4  }
  0x46   :  { %67 = dma.hbm_to_vmem [thread:$0]  %s3451_s5, 2048, %s62_s19, [#allocation9], %s3275_s3, %s3275_s3, %s3276_s27  }
  0x47   :  { %3257 = dma.done.wait [#allocation3], 896  }
  0x48   :  { %3258 = vsyncadd [#allocation3], 4294966400 }
  0x49   :  { %3259 = dma.done.wait [#allocation6], 33280  }
  0x4a   :  { %3260 = vsyncadd [#allocation6], 4294934016 }
  0x4b   :  { %3261 = dma.done.wait [#allocation9], 2048  }
  0x4c   :  { %3262 = vsyncadd [#allocation9], 4294965248  ;;  %v2731_v0 = vld [vmem:[#allocation5 + $0x4] ss:$16 sps:$4 sm:$0xff]   ;;  %v2735_v2 = vld [vmem:[#allocation5] ss:$16 sps:$4 sm:$0xff]  }
  0x4d   :  { %v2733_v1 = vld [vmem:[#allocation5 + $0x204] ss:$16 sps:$4 sm:$0xff]   ;;  %1328 = vmatprep.subr.bf16.mxu1 %v2731_v0  ;;  %v2736_v3 = vld [vmem:[#allocation5 + $0x200] ss:$16 sps:$4 sm:$0xff]   ;;  %v2829_v49 = vld [vmem:[#allocation2 + $0x4] ss:$28 sps:$4 sm:$0xff]  }
  0x4e   :  { %1371 = vmatprep.subr.bf16.mxu0 %v2733_v1  ;;  %v2737_v4 = vld [vmem:[#allocation5 + $0x24] ss:$16 sps:$4 sm:$0xff]   ;;  %1329 = vmatpush1.bf16.msra.mxu1 %v2735_v2  ;;  %v2741_v6 = vld [vmem:[#allocation5 + $0x20] ss:$16 sps:$4 sm:$0xff]   ;;  %vm1324_vm0 = vcmask 130048   ;;  %s3278_s10 = smov [#allocation10]  }
  0x4f   :  { %1372 = vmatpush1.bf16.msra.mxu0 %v2736_v3  ;;  %v2739_v5 = vld [vmem:[#allocation5 + $0x224] ss:$16 sps:$4 sm:$0xff]   ;;  %1330 = vmatprep.subr.bf16.mxu1 %v2737_v4  ;;  %v2742_v7 = vld [vmem:[#allocation5 + $0x220] ss:$16 sps:$4 sm:$0xff]   ;;  %v2838_v3 = vld [vmem:[#allocation5 + $0xc] ss:$16 sps:$4 sm:$0xff]  }
  0x50   :  { %1373 = vmatprep.subr.bf16.mxu0 %v2739_v5  ;;  %v2743_v8 = vld [vmem:[#allocation5 + $0x44] ss:$16 sps:$4 sm:$0xff]   ;;  %v2747_v10 = vld [vmem:[#allocation5 + $0x40] ss:$16 sps:$4 sm:$0xff]   ;;  %1360 = vmatprep.mubr.bf16.mxu1 %v2829_v49  ;;  %s2355_s11 = sshll.u32 %s3278_s10, 4  ;;  %s2356_s11 = int_to_ptr.vmem [resolvable:$true] %s2355_s11 }
  0x51   :  { %v2745_v9 = vld [vmem:[#allocation5 + $0x244] ss:$16 sps:$4 sm:$0xff]   ;;  %v2748_v11 = vld [vmem:[#allocation5 + $0x240] ss:$16 sps:$4 sm:$0xff]   ;;  %s3235_s12 = scalar_lea.vmem %s2356_s11, 256  ;;  %p3240_p5 = scmp.lt.s32.totalorder %s2356_s11, %s2356_s11 }
  0x52   :  { %1331 = vmatpush1.bf16.msra.mxu1 %v2741_v6  ;;  %v2749_v12 = vld [vmem:[#allocation5 + $0x64] ss:$16 sps:$4 sm:$0xff]   ;;  %v2753_v14 = vld [vmem:[#allocation5 + $0x60] ss:$16 sps:$4 sm:$0xff]   ;;  %p3236_p4 = scmp.ne.s32.totalorder %s2356_s11, %s3235_s12  ;;  %p3241_p6 = scmp.lt.s32.totalorder %s3235_s12, %s3235_s12 }
  0x53   :  { %1374 = vmatpush1.bf16.msra.mxu0 %v2742_v7  ;;  %1332 = vmatprep.subr.bf16.mxu1 %v2743_v8  ;;  %v2751_v13 = vld [vmem:[#allocation5 + $0x264] ss:$16 sps:$4 sm:$0xff]   ;;  %v2754_v15 = vld [vmem:[#allocation5 + $0x260] ss:$16 sps:$4 sm:$0xff]   ;;  %v2836_v7 = vld [vmem:[#allocation5 + $0x8] ss:$16 sps:$4 sm:$0xff]  }
  0x54   :  { %1375 = vmatprep.subr.bf16.mxu0 %v2745_v9  ;;  %v2755_v16 = vld [vmem:[#allocation5 + $0x84] ss:$16 sps:$4 sm:$0xff]   ;;  %v2759_v18 = vld [vmem:[#allocation5 + $0x80] ss:$16 sps:$4 sm:$0xff]   ;;  %v2844_v9 = vld [vmem:[#allocation5 + $0x2c] ss:$16 sps:$4 sm:$0xff]   ;;  %p3242_p7 = por %p3241_p6, %p3240_p5 }
  0x55   :  { %v2757_v17 = vld [vmem:[#allocation5 + $0x284] ss:$16 sps:$4 sm:$0xff]   ;;  %v2760_v19 = vld [vmem:[#allocation5 + $0x280] ss:$16 sps:$4 sm:$0xff]  }
  0x56   :  { %1333 = vmatpush1.bf16.msra.mxu1 %v2747_v10  ;;  %v2761_v20 = vld [vmem:[#allocation5 + $0xa4] ss:$16 sps:$4 sm:$0xff]   ;;  %v2765_v22 = vld [vmem:[#allocation5 + $0xa0] ss:$16 sps:$4 sm:$0xff]   ;;  %p3243_p8 = pnand %p3242_p7, %p3236_p4 }
  0x57   :  { %1376 = vmatpush1.bf16.msra.mxu0 %v2748_v11  ;;  %1334 = vmatprep.subr.bf16.mxu1 %v2749_v12  ;;  %v2763_v21 = vld [vmem:[#allocation5 + $0x2a4] ss:$16 sps:$4 sm:$0xff]   ;;  %v2766_v23 = vld [vmem:[#allocation5 + $0x2a0] ss:$16 sps:$4 sm:$0xff]   ;;  %v2842_v11 = vld [vmem:[#allocation5 + $0x28] ss:$16 sps:$4 sm:$0xff]  }
  0x58   :  { %1377 = vmatprep.subr.bf16.mxu0 %v2751_v13  ;;  %v2767_v24 = vld [vmem:[#allocation5 + $0xc4] ss:$16 sps:$4 sm:$0xff]   ;;  %v2771_v26 = vld [vmem:[#allocation5 + $0xc0] ss:$16 sps:$4 sm:$0xff]   ;;  %v2850_v13 = vld [vmem:[#allocation5 + $0x4c] ss:$16 sps:$4 sm:$0xff]  }
  0x59   :  { %v2769_v25 = vld [vmem:[#allocation5 + $0x2c4] ss:$16 sps:$4 sm:$0xff]   ;;  %v2772_v27 = vld [vmem:[#allocation5 + $0x2c0] ss:$16 sps:$4 sm:$0xff]  }
  0x5a   :  { %1335 = vmatpush1.bf16.msra.mxu1 %v2753_v14  ;;  %v2773_v28 = vld [vmem:[#allocation5 + $0xe4] ss:$16 sps:$4 sm:$0xff]   ;;  %v2777_v30 = vld [vmem:[#allocation5 + $0xe0] ss:$16 sps:$4 sm:$0xff]  }
  0x5b   :  { %1378 = vmatpush1.bf16.msra.mxu0 %v2754_v15  ;;  %1336 = vmatprep.subr.bf16.mxu1 %v2755_v16  ;;  %v2775_v29 = vld [vmem:[#allocation5 + $0x2e4] ss:$16 sps:$4 sm:$0xff]   ;;  %v2778_v31 = vld [vmem:[#allocation5 + $0x2e0] ss:$16 sps:$4 sm:$0xff]   ;;  %v2848_v15 = vld [vmem:[#allocation5 + $0x48] ss:$16 sps:$4 sm:$0xff]  }
  0x5c   :  { %1379 = vmatprep.subr.bf16.mxu0 %v2757_v17  ;;  %v2779_v32 = vld [vmem:[#allocation5 + $0x104] ss:$16 sps:$4 sm:$0xff]   ;;  %v2783_v34 = vld [vmem:[#allocation5 + $0x100] ss:$16 sps:$4 sm:$0xff]   ;;  %v2856_v17 = vld [vmem:[#allocation5 + $0x6c] ss:$16 sps:$4 sm:$0xff]  }
  0x5d   :  { %v2781_v33 = vld [vmem:[#allocation5 + $0x304] ss:$16 sps:$4 sm:$0xff]   ;;  %v2784_v35 = vld [vmem:[#allocation5 + $0x300] ss:$16 sps:$4 sm:$0xff]  }
  0x5e   :  { %1337 = vmatpush1.bf16.msra.mxu1 %v2759_v18  ;;  %v2785_v36 = vld [vmem:[#allocation5 + $0x124] ss:$16 sps:$4 sm:$0xff]   ;;  %v2789_v38 = vld [vmem:[#allocation5 + $0x120] ss:$16 sps:$4 sm:$0xff]  }
  0x5f   :  { %1380 = vmatpush1.bf16.msra.mxu0 %v2760_v19  ;;  %1338 = vmatprep.subr.bf16.mxu1 %v2761_v20  ;;  %v2787_v37 = vld [vmem:[#allocation5 + $0x324] ss:$16 sps:$4 sm:$0xff]   ;;  %v2790_v39 = vld [vmem:[#allocation5 + $0x320] ss:$16 sps:$4 sm:$0xff]   ;;  %v2854_v19 = vld [vmem:[#allocation5 + $0x68] ss:$16 sps:$4 sm:$0xff]  }
  0x60   :  { %1381 = vmatprep.subr.bf16.mxu0 %v2763_v21  ;;  %v2791_v40 = vld [vmem:[#allocation5 + $0x144] ss:$16 sps:$4 sm:$0xff]   ;;  %v2795_v42 = vld [vmem:[#allocation5 + $0x140] ss:$16 sps:$4 sm:$0xff]   ;;  %v2862_v21 = vld [vmem:[#allocation5 + $0x8c] ss:$16 sps:$4 sm:$0xff]  }
  0x61   :  { %v2793_v41 = vld [vmem:[#allocation5 + $0x344] ss:$16 sps:$4 sm:$0xff]   ;;  %v2796_v43 = vld [vmem:[#allocation5 + $0x340] ss:$16 sps:$4 sm:$0xff]  }
  0x62   :  { %1339 = vmatpush1.bf16.msra.mxu1 %v2765_v22  ;;  %v2797_v44 = vld [vmem:[#allocation5 + $0x164] ss:$16 sps:$4 sm:$0xff]   ;;  %v2801_v46 = vld [vmem:[#allocation5 + $0x160] ss:$16 sps:$4 sm:$0xff]  }
  0x63   :  { %1382 = vmatpush1.bf16.msra.mxu0 %v2766_v23  ;;  %1340 = vmatprep.subr.bf16.mxu1 %v2767_v24  ;;  %v2799_v45 = vld [vmem:[#allocation5 + $0x364] ss:$16 sps:$4 sm:$0xff]   ;;  %v2802_v47 = vld [vmem:[#allocation5 + $0x360] ss:$16 sps:$4 sm:$0xff]   ;;  %v2860_v23 = vld [vmem:[#allocation5 + $0x88] ss:$16 sps:$4 sm:$0xff]  }
  0x64   :  { %1383 = vmatprep.subr.bf16.mxu0 %v2769_v25  ;;  %v2803_v48 = vld [vmem:[#allocation5 + $0x184] ss:$16 sps:$4 sm:$0xff]   ;;  %v2807_v52 = vld [vmem:[#allocation5 + $0x180] ss:$16 sps:$4 sm:$0xff]   ;;  %v2868_v25 = vld [vmem:[#allocation5 + $0xac] ss:$16 sps:$4 sm:$0xff]  }
  0x65   :  { %v2805_v50 = vld [vmem:[#allocation5 + $0x384] ss:$16 sps:$4 sm:$0xff]   ;;  %v2808_v53 = vld [vmem:[#allocation5 + $0x380] ss:$16 sps:$4 sm:$0xff]  }
  0x66   :  { %1341 = vmatpush1.bf16.msra.mxu1 %v2771_v26  ;;  %v3370_v51 = vld [vmem:[#allocation2 + $0xc] ss:$28 sps:$4 sm:$0xff]   ;;  %v3373_v4 = vld [vmem:[#allocation2] ss:$28 sps:$4 sm:$0xff]  }
  0x67   :  { %1384 = vmatpush1.bf16.msra.mxu0 %v2772_v27  ;;  %1342 = vmatprep.subr.bf16.mxu1 %v2773_v28  ;;  %v2809_v54 = vld [vmem:[#allocation5 + $0x1a4] ss:$16 sps:$4 sm:$0xff]   ;;  %v2813_v56 = vld [vmem:[#allocation5 + $0x1a0] ss:$16 sps:$4 sm:$0xff]   ;;  %v2866_v27 = vld [vmem:[#allocation5 + $0xa8] ss:$16 sps:$4 sm:$0xff]  }
  0x68   :  { %1385 = vmatprep.subr.bf16.mxu0 %v2775_v29  ;;  %1403 = vmatprep.mubr.bf16.mxu0 %v3370_v51  ;;  %v2811_v55 = vld [vmem:[#allocation5 + $0x3a4] ss:$16 sps:$4 sm:$0xff]   ;;  %v2814_v57 = vld [vmem:[#allocation5 + $0x3a0] ss:$16 sps:$4 sm:$0xff]   ;;  %v2874_v29 = vld [vmem:[#allocation5 + $0xcc] ss:$16 sps:$4 sm:$0xff]  }
  0x69   :  { %v2815_v58 = vld [vmem:[#allocation5 + $0x1c4] ss:$16 sps:$4 sm:$0xff]   ;;  %v2819_v60 = vld [vmem:[#allocation5 + $0x1c0] ss:$16 sps:$4 sm:$0xff]  }
  0x6a   :  { %1343 = vmatpush1.bf16.msra.mxu1 %v2777_v30  ;;  %v2817_v59 = vld [vmem:[#allocation5 + $0x3c4] ss:$16 sps:$4 sm:$0xff]   ;;  %v2820_v61 = vld [vmem:[#allocation5 + $0x3c0] ss:$16 sps:$4 sm:$0xff]  }
  0x6b   :  { %1386 = vmatpush1.bf16.msra.mxu0 %v2778_v31  ;;  %1344 = vmatprep.subr.bf16.mxu1 %v2779_v32  ;;  %v2821_v62 = vld [vmem:[#allocation5 + $0x1e4] ss:$16 sps:$4 sm:$0xff]   ;;  %v2825_v0 = vld [vmem:[#allocation5 + $0x1e0] ss:$16 sps:$4 sm:$0xff]   ;;  %v2872_v31 = vld [vmem:[#allocation5 + $0xc8] ss:$16 sps:$4 sm:$0xff]  }
  0x6c   :  { %1387 = vmatprep.subr.bf16.mxu0 %v2781_v33  ;;  %v2823_v63 = vld [vmem:[#allocation5 + $0x3e4] ss:$16 sps:$4 sm:$0xff]   ;;  %v2826_v1 = vld [vmem:[#allocation5 + $0x3e0] ss:$16 sps:$4 sm:$0xff]   ;;  %v2880_v33 = vld [vmem:[#allocation5 + $0xec] ss:$16 sps:$4 sm:$0xff]  }
  0x6d   :  { %v2835_v2 = vld [vmem:[#allocation5 + $0x404] ss:$16 sps:$4 sm:$0xff]   ;;  %v3375_v5 = vld [vmem:[#allocation2 + $0x8] ss:$28 sps:$4 sm:$0xff]  }
  0x6e   :  { %1345 = vmatpush1.bf16.msra.mxu1 %v2783_v34  ;;  %v2833_v6 = vld [vmem:[#allocation5 + $0x400] ss:$16 sps:$4 sm:$0xff]   ;;  %v2841_v8 = vld [vmem:[#allocation5 + $0x424] ss:$16 sps:$4 sm:$0xff]   ;;  %v3379_v34 = vld [vmem:[#allocation2 + $0x14] ss:$28 sps:$4 sm:$0xff]  }
  0x6f   :  { %1388 = vmatpush1.bf16.msra.mxu0 %v2784_v35  ;;  %1346 = vmatprep.subr.bf16.mxu1 %v2785_v36  ;;  %v2839_v10 = vld [vmem:[#allocation5 + $0x420] ss:$16 sps:$4 sm:$0xff]   ;;  %v2847_v12 = vld [vmem:[#allocation5 + $0x444] ss:$16 sps:$4 sm:$0xff]   ;;  %v2878_v36 = vld [vmem:[#allocation5 + $0xe8] ss:$16 sps:$4 sm:$0xff]  }
  0x70   :  { %1389 = vmatprep.subr.bf16.mxu0 %v2787_v37  ;;  %v2845_v14 = vld [vmem:[#allocation5 + $0x440] ss:$16 sps:$4 sm:$0xff]   ;;  %v2853_v16 = vld [vmem:[#allocation5 + $0x464] ss:$16 sps:$4 sm:$0xff]  }
  0x71   :  { %v2851_v18 = vld [vmem:[#allocation5 + $0x460] ss:$16 sps:$4 sm:$0xff]   ;;  %v2859_v20 = vld [vmem:[#allocation5 + $0x484] ss:$16 sps:$4 sm:$0xff]  }
  0x72   :  { %1347 = vmatpush1.bf16.msra.mxu1 %v2789_v38  ;;  %v2857_v22 = vld [vmem:[#allocation5 + $0x480] ss:$16 sps:$4 sm:$0xff]   ;;  %v2865_v24 = vld [vmem:[#allocation5 + $0x4a4] ss:$16 sps:$4 sm:$0xff]   ;;  %v2886_v38 = vld [vmem:[#allocation5 + $0x10c] ss:$16 sps:$4 sm:$0xff]  }
  0x73   :  { %1390 = vmatpush1.bf16.msra.mxu0 %v2790_v39  ;;  %1348 = vmatprep.subr.bf16.mxu1 %v2791_v40  ;;  %v2863_v26 = vld [vmem:[#allocation5 + $0x4a0] ss:$16 sps:$4 sm:$0xff]   ;;  %v2871_v28 = vld [vmem:[#allocation5 + $0x4c4] ss:$16 sps:$4 sm:$0xff]   ;;  %v2884_v40 = vld [vmem:[#allocation5 + $0x108] ss:$16 sps:$4 sm:$0xff]  }
  0x74   :  { %1391 = vmatprep.subr.bf16.mxu0 %v2793_v41  ;;  %v2869_v30 = vld [vmem:[#allocation5 + $0x4c0] ss:$16 sps:$4 sm:$0xff]   ;;  %v2877_v32 = vld [vmem:[#allocation5 + $0x4e4] ss:$16 sps:$4 sm:$0xff]  }
  0x75   :  { %v2875_v35 = vld [vmem:[#allocation5 + $0x4e0] ss:$16 sps:$4 sm:$0xff]   ;;  %v2883_v37 = vld [vmem:[#allocation5 + $0x504] ss:$16 sps:$4 sm:$0xff]  }
  0x76   :  { %1349 = vmatpush1.bf16.msra.mxu1 %v2795_v42  ;;  %v2881_v39 = vld [vmem:[#allocation5 + $0x500] ss:$16 sps:$4 sm:$0xff]   ;;  %v2889_v41 = vld [vmem:[#allocation5 + $0x524] ss:$16 sps:$4 sm:$0xff]   ;;  %v2892_v42 = vld [vmem:[#allocation5 + $0x12c] ss:$16 sps:$4 sm:$0xff]  }
  0x77   :  { %1392 = vmatpush1.bf16.msra.mxu0 %v2796_v43  ;;  %1350 = vmatprep.subr.bf16.mxu1 %v2797_v44  ;;  %v2887_v43 = vld [vmem:[#allocation5 + $0x520] ss:$16 sps:$4 sm:$0xff]   ;;  %v2890_v44 = vld [vmem:[#allocation5 + $0x128] ss:$16 sps:$4 sm:$0xff]  }
  0x78   :  { %1393 = vmatprep.subr.bf16.mxu0 %v2799_v45  ;;  %v2895_v45 = vld [vmem:[#allocation5 + $0x544] ss:$16 sps:$4 sm:$0xff]  }
  0x7a   :  { %1351 = vmatpush1.bf16.msra.mxu1 %v2801_v46  ;;  %v2898_v46 = vld [vmem:[#allocation5 + $0x14c] ss:$16 sps:$4 sm:$0xff]  }
  0x7b   :  { %1394 = vmatpush1.bf16.msra.mxu0 %v2802_v47  ;;  %1352 = vmatprep.subr.bf16.mxu1 %v2803_v48  ;;  %v2893_v47 = vld [vmem:[#allocation5 + $0x540] ss:$16 sps:$4 sm:$0xff]   ;;  %v2896_v48 = vld [vmem:[#allocation5 + $0x148] ss:$16 sps:$4 sm:$0xff]  }
  0x7c   :  { %1395 = vmatprep.subr.bf16.mxu0 %v2805_v50  ;;  %v2904_v50 = vld [vmem:[#allocation5 + $0x16c] ss:$16 sps:$4 sm:$0xff]  }
  0x7e   :  { %1353 = vmatpush1.bf16.msra.mxu1 %v2807_v52  ;;  %v2899_v52 = vld [vmem:[#allocation5 + $0x560] ss:$16 sps:$4 sm:$0xff]  }
  0x7f   :  { %1396 = vmatpush1.bf16.msra.mxu0 %v2808_v53  ;;  %1354 = vmatprep.subr.bf16.mxu1 %v2809_v54  ;;  %v2902_v53 = vld [vmem:[#allocation5 + $0x168] ss:$16 sps:$4 sm:$0xff]   ;;  %v2907_v54 = vld [vmem:[#allocation5 + $0x584] ss:$16 sps:$4 sm:$0xff]  }
  0x80   :  { %1397 = vmatprep.subr.bf16.mxu0 %v2811_v55  ;;  %v2910_v55 = vld [vmem:[#allocation5 + $0x18c] ss:$16 sps:$4 sm:$0xff]  }
  0x82   :  { %1355 = vmatpush1.bf16.msra.mxu1 %v2813_v56  ;;  %v2905_v56 = vld [vmem:[#allocation5 + $0x580] ss:$16 sps:$4 sm:$0xff]  }
  0x83   :  { %1398 = vmatpush1.bf16.msra.mxu0 %v2814_v57  ;;  %1356 = vmatprep.subr.bf16.mxu1 %v2815_v58  ;;  %v2908_v57 = vld [vmem:[#allocation5 + $0x188] ss:$16 sps:$4 sm:$0xff]   ;;  %v2913_v58 = vld [vmem:[#allocation5 + $0x5a4] ss:$16 sps:$4 sm:$0xff]  }
  0x84   :  { %1399 = vmatprep.subr.bf16.mxu0 %v2817_v59  ;;  %v2916_v59 = vld [vmem:[#allocation5 + $0x1ac] ss:$16 sps:$4 sm:$0xff]  }
  0x86   :  { %1357 = vmatpush1.bf16.msra.mxu1 %v2819_v60  ;;  %v2911_v60 = vld [vmem:[#allocation5 + $0x5a0] ss:$16 sps:$4 sm:$0xff]  }
  0x87   :  { %1400 = vmatpush1.bf16.msra.mxu0 %v2820_v61  ;;  %1358 = vmatprep.subr.bf16.mxu1 %v2821_v62  ;;  %v2914_v61 = vld [vmem:[#allocation5 + $0x1a8] ss:$16 sps:$4 sm:$0xff]   ;;  %v2919_v62 = vld [vmem:[#allocation5 + $0x5c4] ss:$16 sps:$4 sm:$0xff]  }
  0x88   :  { %1401 = vmatprep.subr.bf16.mxu0 %v2823_v63  ;;  %v2922_v63 = vld [vmem:[#allocation5 + $0x1cc] ss:$16 sps:$4 sm:$0xff]  }
  0x8a   :  { %1359 = vmatpush1.bf16.msra.mxu1 %v2825_v0  ;;  %v2917_v0 = vld [vmem:[#allocation5 + $0x5c0] ss:$16 sps:$4 sm:$0xff]  }
  0x8b   :  { %1402 = vmatpush1.bf16.msra.mxu0 %v2826_v1  ;;  %1500 = vmatprep.subr.bf16.mxu1 %v2838_v3  ;;  %v2920_v1 = vld [vmem:[#allocation5 + $0x1c8] ss:$16 sps:$4 sm:$0xff]   ;;  %v2928_v3 = vld [vmem:[#allocation5 + $0x1ec] ss:$16 sps:$4 sm:$0xff]  }
  0x8c   :  { %1414 = vmatprep.subr.bf16.mxu0 %v2835_v2  ;;  %v2925_v2 = vld [vmem:[#allocation5 + $0x5e4] ss:$16 sps:$4 sm:$0xff]  }
  0x8d   :  { %1361 = vmatmul.mubr.bf16.vlgmr.msra.gmra.mrb[0].mxu1 %v3373_v4 }
  0x8e   :  { %1404 = vmatmul.mubr.bf16.vlgmr.msra.gmra.mrb[0].mxu0 %v3375_v5  ;;  %1501 = vmatpush1.bf16.msra.mxu1 %v2836_v7  ;;  %v2926_v7 = vld [vmem:[#allocation5 + $0x1e8] ss:$16 sps:$4 sm:$0xff]  }
  0x8f   :  { %1415 = vmatpush1.bf16.msra.mxu0 %v2833_v6  ;;  %1502 = vmatprep.subr.bf16.mxu1 %v2844_v9  ;;  %v2923_v6 = vld [vmem:[#allocation5 + $0x5e0] ss:$16 sps:$4 sm:$0xff]   ;;  %v2940_v9 = vld [vmem:[#allocation5 + $0x604] ss:$16 sps:$4 sm:$0xff]  }
  0x90   :  { %1416 = vmatprep.subr.bf16.mxu0 %v2841_v8  ;;  %1532 = vmatprep.mubr.bf16.mxu1 %v2829_v49  ;;  %v2901_v49 = vld [vmem:[#allocation5 + $0x564] ss:$16 sps:$4 sm:$0xff]   ;;  %v2934_v8 = vld [vmem:[#allocation5 + $0x20c] ss:$16 sps:$4 sm:$0xff]  }
  0x91   :  { %1446 = vmatprep.mubr.bf16.mxu0 %v3379_v34 }
  0x92   :  { %1503 = vmatpush1.bf16.msra.mxu1 %v2842_v11  ;;  %v2932_v11 = vld [vmem:[#allocation5 + $0x208] ss:$16 sps:$4 sm:$0xff]  }
  0x93   :  { %1417 = vmatpush1.bf16.msra.mxu0 %v2839_v10  ;;  %1504 = vmatprep.subr.bf16.mxu1 %v2850_v13  ;;  %v3382_v10 = vld [vmem:[#allocation2 + $0x10] ss:$28 sps:$4 sm:$0xff]   ;;  %v2937_v13 = vld [vmem:[#allocation5 + $0x22c] ss:$16 sps:$4 sm:$0xff]  }
  0x94   :  { %1418 = vmatprep.subr.bf16.mxu0 %v2847_v12  ;;  %v2938_v12 = vld [vmem:[#allocation5 + $0x600] ss:$16 sps:$4 sm:$0xff]  }
  0x96   :  { %1505 = vmatpush1.bf16.msra.mxu1 %v2848_v15  ;;  %v2943_v15 = vld [vmem:[#allocation5 + $0x24c] ss:$16 sps:$4 sm:$0xff]  }
  0x97   :  { %1419 = vmatpush1.bf16.msra.mxu0 %v2845_v14  ;;  %1506 = vmatprep.subr.bf16.mxu1 %v2856_v17  ;;  %v2935_v14 = vld [vmem:[#allocation5 + $0x228] ss:$16 sps:$4 sm:$0xff]   ;;  %v3031_v17 = vld [vmem:[#allocation5 + $0x60c] ss:$16 sps:$4 sm:$0xff]  }
  0x98   :  { %1420 = vmatprep.subr.bf16.mxu0 %v2853_v16  ;;  %v3277_v16 = vmov 0  }
  0x9a   :  { %1507 = vmatpush1.bf16.msra.mxu1 %v2854_v19  ;;  %v2947_v19 = vld [vmem:[#allocation5 + $0x26c] ss:$16 sps:$4 sm:$0xff]  }
  0x9b   :  { %1421 = vmatpush1.bf16.msra.mxu0 %v2851_v18  ;;  %1508 = vmatprep.subr.bf16.mxu1 %v2862_v21  ;;  %v2941_v18 = vld [vmem:[#allocation5 + $0x248] ss:$16 sps:$4 sm:$0xff]  }
  0x9c   :  { %1422 = vmatprep.subr.bf16.mxu0 %v2859_v20  ;;  %v2944_v20 = vld [vmem:[#allocation2 + $0x18] ss:$28 sps:$4 sm:$0xff]   ;;  %v2945_v21 = vld [vmem:[#allocation5 + $0x268] ss:$16 sps:$4 sm:$0xff]  }
  0x9e   :  { %1509 = vmatpush1.bf16.msra.mxu1 %v2860_v23  ;;  %v2950_v23 = vld [vmem:[#allocation5 + $0x28c] ss:$16 sps:$4 sm:$0xff]  }
  0x9f   :  { %1423 = vmatpush1.bf16.msra.mxu0 %v2857_v22  ;;  %1510 = vmatprep.subr.bf16.mxu1 %v2868_v25  ;;  %v3029_v22 = vld [vmem:[#allocation5 + $0x608] ss:$16 sps:$4 sm:$0xff]   ;;  %v2956_v25 = vld [vmem:[#allocation5 + $0x2cc] ss:$16 sps:$4 sm:$0xff]  }
  0xa0   :  { %1424 = vmatprep.subr.bf16.mxu0 %v2865_v24  ;;  %v2953_v24 = vld [vmem:[#allocation5 + $0x2ac] ss:$16 sps:$4 sm:$0xff]  }
  0xa2   :  { %1511 = vmatpush1.bf16.msra.mxu1 %v2866_v27  ;;  %v2959_v27 = vld [vmem:[#allocation5 + $0x2ec] ss:$16 sps:$4 sm:$0xff]  }
  0xa3   :  { %1425 = vmatpush1.bf16.msra.mxu0 %v2863_v26  ;;  %1512 = vmatprep.subr.bf16.mxu1 %v2874_v29  ;;  %v2954_v26 = vld [vmem:[#allocation5 + $0x2c8] ss:$16 sps:$4 sm:$0xff]   ;;  %v3037_v29 = vld [vmem:[#allocation7 + $0x4] ss:$8 sps:$4 sm:$0xff]  }
  0xa4   :  { %1426 = vmatprep.subr.bf16.mxu0 %v2871_v28  ;;  %v3035_v28 = vld [vmem:[#allocation7] ss:$8 sps:$4 sm:$0xff]  }
  0xa6   :  { %1513 = vmatpush1.bf16.msra.mxu1 %v2872_v31  ;;  %v2957_v31 = vld [vmem:[#allocation5 + $0x2e8] ss:$16 sps:$4 sm:$0xff]  }
  0xa7   :  { %1427 = vmatpush1.bf16.msra.mxu0 %v2869_v30  ;;  %1514 = vmatprep.subr.bf16.mxu1 %v2880_v33  ;;  %v3040_v30 = vld [vmem:[#allocation7 + $0x14] ss:$8 sps:$4 sm:$0xff]   ;;  %v3038_v33 = vld [vmem:[#allocation7 + $0x10] ss:$8 sps:$4 sm:$0xff]  }
  0xa8   :  { %1428 = vmatprep.subr.bf16.mxu0 %v2877_v32  ;;  %v2962_v32 = vld [vmem:[#allocation5 + $0x30c] ss:$16 sps:$4 sm:$0xff]  }
  0xaa   :  { %1515 = vmatpush1.bf16.msra.mxu1 %v2878_v36  ;;  %v2960_v36 = vld [vmem:[#allocation5 + $0x308] ss:$16 sps:$4 sm:$0xff]  }
  0xab   :  { %1429 = vmatpush1.bf16.msra.mxu0 %v2875_v35  ;;  %1516 = vmatprep.subr.bf16.mxu1 %v2886_v38  ;;  %v3043_v35 = vld [vmem:[#allocation7 + $0x24] ss:$8 sps:$4 sm:$0xff]   ;;  %v3041_v38 = vld [vmem:[#allocation7 + $0x20] ss:$8 sps:$4 sm:$0xff]  }
  0xac   :  { %1430 = vmatprep.subr.bf16.mxu0 %v2883_v37  ;;  %v2965_v37 = vld [vmem:[#allocation5 + $0x32c] ss:$16 sps:$4 sm:$0xff]  }
  0xae   :  { %1517 = vmatpush1.bf16.msra.mxu1 %v2884_v40  ;;  %v3046_v40 = vld [vmem:[#allocation7 + $0x34] ss:$8 sps:$4 sm:$0xff]  }
  0xaf   :  { %1431 = vmatpush1.bf16.msra.mxu0 %v2881_v39  ;;  %1518 = vmatprep.subr.bf16.mxu1 %v2892_v42  ;;  %v2963_v39 = vld [vmem:[#allocation5 + $0x328] ss:$16 sps:$4 sm:$0xff]  }
  0xb0   :  { %1432 = vmatprep.subr.bf16.mxu0 %v2889_v41  ;;  %v2968_v41 = vld [vmem:[#allocation5 + $0x34c] ss:$16 sps:$4 sm:$0xff]   ;;  %v3044_v42 = vld [vmem:[#allocation7 + $0x30] ss:$8 sps:$4 sm:$0xff]  }
  0xb2   :  { %1519 = vmatpush1.bf16.msra.mxu1 %v2890_v44  ;;  %v2966_v44 = vld [vmem:[#allocation5 + $0x348] ss:$16 sps:$4 sm:$0xff]  }
  0xb3   :  { %1433 = vmatpush1.bf16.msra.mxu0 %v2887_v43  ;;  %1520 = vmatprep.subr.bf16.mxu1 %v2898_v46  ;;  %v3049_v43 = vld [vmem:[#allocation7 + $0x44] ss:$8 sps:$4 sm:$0xff]   ;;  %v3047_v46 = vld [vmem:[#allocation7 + $0x40] ss:$8 sps:$4 sm:$0xff]  }
  0xb4   :  { %1434 = vmatprep.subr.bf16.mxu0 %v2895_v45  ;;  %v2971_v45 = vld [vmem:[#allocation5 + $0x36c] ss:$16 sps:$4 sm:$0xff]  }
  0xb6   :  { %1521 = vmatpush1.bf16.msra.mxu1 %v2896_v48  ;;  %v2969_v48 = vld [vmem:[#allocation5 + $0x368] ss:$16 sps:$4 sm:$0xff]  }
  0xb7   :  { %1435 = vmatpush1.bf16.msra.mxu0 %v2893_v47  ;;  %1522 = vmatprep.subr.bf16.mxu1 %v2904_v50  ;;  %v3052_v47 = vld [vmem:[#allocation7 + $0x54] ss:$8 sps:$4 sm:$0xff]   ;;  %v3050_v50 = vld [vmem:[#allocation7 + $0x50] ss:$8 sps:$4 sm:$0xff]  }
  0xb8   :  { %1436 = vmatprep.subr.bf16.mxu0 %v2901_v49  ;;  %v2974_v49 = vld [vmem:[#allocation5 + $0x38c] ss:$16 sps:$4 sm:$0xff]  }
  0xba   :  { %1523 = vmatpush1.bf16.msra.mxu1 %v2902_v53  ;;  %v2972_v53 = vld [vmem:[#allocation5 + $0x388] ss:$16 sps:$4 sm:$0xff]  }
  0xbb   :  { %1437 = vmatpush1.bf16.msra.mxu0 %v2899_v52  ;;  %1524 = vmatprep.subr.bf16.mxu1 %v2910_v55  ;;  %v3055_v52 = vld [vmem:[#allocation7 + $0x64] ss:$8 sps:$4 sm:$0xff]   ;;  %v3053_v55 = vld [vmem:[#allocation7 + $0x60] ss:$8 sps:$4 sm:$0xff]  }
  0xbc   :  { %1438 = vmatprep.subr.bf16.mxu0 %v2907_v54  ;;  %v2977_v54 = vld [vmem:[#allocation5 + $0x3ac] ss:$16 sps:$4 sm:$0xff]  }
  0xbe   :  { %1525 = vmatpush1.bf16.msra.mxu1 %v2908_v57  ;;  %v2975_v57 = vld [vmem:[#allocation5 + $0x3a8] ss:$16 sps:$4 sm:$0xff]  }
  0xbf   :  { %1439 = vmatpush1.bf16.msra.mxu0 %v2905_v56  ;;  %1526 = vmatprep.subr.bf16.mxu1 %v2916_v59  ;;  %v3058_v56 = vld [vmem:[#allocation7 + $0x74] ss:$8 sps:$4 sm:$0xff]   ;;  %v3056_v59 = vld [vmem:[#allocation7 + $0x70] ss:$8 sps:$4 sm:$0xff]  }
  0xc0   :  { %1440 = vmatprep.subr.bf16.mxu0 %v2913_v58  ;;  %v2980_v58 = vld [vmem:[#allocation5 + $0x3cc] ss:$16 sps:$4 sm:$0xff]  }
  0xc2   :  { %1527 = vmatpush1.bf16.msra.mxu1 %v2914_v61  ;;  %v2978_v61 = vld [vmem:[#allocation5 + $0x3c8] ss:$16 sps:$4 sm:$0xff]  }
  0xc3   :  { %1441 = vmatpush1.bf16.msra.mxu0 %v2911_v60  ;;  %1528 = vmatprep.subr.bf16.mxu1 %v2922_v63  ;;  %v3061_v60 = vld [vmem:[#allocation7 + $0x84] ss:$8 sps:$4 sm:$0xff]   ;;  %v3059_v63 = vld [vmem:[#allocation7 + $0x80] ss:$8 sps:$4 sm:$0xff]  }
  0xc4   :  { %1442 = vmatprep.subr.bf16.mxu0 %v2919_v62  ;;  %v2983_v62 = vld [vmem:[#allocation5 + $0x3ec] ss:$16 sps:$4 sm:$0xff]  }
  0xc6   :  { %1529 = vmatpush1.bf16.msra.mxu1 %v2920_v1  ;;  %v2981_v1 = vld [vmem:[#allocation5 + $0x3e8] ss:$16 sps:$4 sm:$0xff]  }
  0xc7   :  { %1443 = vmatpush1.bf16.msra.mxu0 %v2917_v0  ;;  %1530 = vmatprep.subr.bf16.mxu1 %v2928_v3  ;;  %v3064_v0 = vld [vmem:[#allocation7 + $0x94] ss:$8 sps:$4 sm:$0xff]   ;;  %v3062_v3 = vld [vmem:[#allocation7 + $0x90] ss:$8 sps:$4 sm:$0xff]  }
  0xc8   :  { %1444 = vmatprep.subr.bf16.mxu0 %v2925_v2  ;;  %v2986_v2 = vld [vmem:[#allocation5 + $0x40c] ss:$16 sps:$4 sm:$0xff]  }
  0xca   :  { %1531 = vmatpush1.bf16.msra.mxu1 %v2926_v7  ;;  %v2984_v7 = vld [vmem:[#allocation5 + $0x408] ss:$16 sps:$4 sm:$0xff]  }
  0xcb   :  { %1445 = vmatpush1.bf16.msra.mxu0 %v2923_v6  ;;  %1543 = vmatprep.subr.bf16.mxu1 %v2934_v8  ;;  %v3067_v6 = vld [vmem:[#allocation7 + $0xa4] ss:$8 sps:$4 sm:$0xff]  }
  0xcc   :  { %1457 = vmatprep.subr.bf16.mxu0 %v2940_v9  ;;  %v2989_v8 = vld [vmem:[#allocation5 + $0x42c] ss:$16 sps:$4 sm:$0xff]   ;;  %v3065_v9 = vld [vmem:[#allocation7 + $0xa0] ss:$8 sps:$4 sm:$0xff]  }
  0xcd   :  { %1533 = vmatmul.mubr.bf16.vlgmr.msra.gmra.mrb[4].mxu1 %v3373_v4  ;;  %v2948_v4 = vld [vmem:[#allocation5 + $0x288] ss:$16 sps:$4 sm:$0xff]  }
  0xce   :  { %1447 = vmatmul.mubr.bf16.vlgmr.msra.gmra.mrb[0].mxu0 %v3382_v10  ;;  %1544 = vmatpush1.bf16.msra.mxu1 %v2932_v11  ;;  %v3070_v11 = vld [vmem:[#allocation7 + $0xb4] ss:$8 sps:$4 sm:$0xff]  }
  0xcf   :  { %1458 = vmatpush1.bf16.msra.mxu0 %v2938_v12  ;;  %1545 = vmatprep.subr.bf16.mxu1 %v2937_v13  ;;  %v2987_v12 = vld [vmem:[#allocation5 + $0x428] ss:$16 sps:$4 sm:$0xff]   ;;  %v2992_v13 = vld [vmem:[#allocation5 + $0x44c] ss:$16 sps:$4 sm:$0xff]  }
  0xd0   :  { %1489 = vmatprep.mubr.bf16.mxu0 %v3277_v16  ;;  %1575 = vmatprep.mubr.bf16.mxu1 %v3370_v51  ;;  %v2951_v51 = vld [vmem:[#allocation5 + $0x2a8] ss:$16 sps:$4 sm:$0xff]  }
  0xd1   :  { %1629 = vmatprep.subr.bf16.mxu0 %v3031_v17  ;;  %v2995_v17 = vld [vmem:[#allocation5 + $0x46c] ss:$16 sps:$4 sm:$0xff]  }
  0xd2   :  { %1546 = vmatpush1.bf16.msra.mxu1 %v2935_v14  ;;  %v3068_v14 = vld [vmem:[#allocation7 + $0xb0] ss:$8 sps:$4 sm:$0xff]  }
  0xd3   :  { %1547 = vmatprep.subr.bf16.mxu1 %v2943_v15  ;;  %v3073_v15 = vld [vmem:[#allocation7 + $0xc4] ss:$8 sps:$4 sm:$0xff]  }
  0xd6   :  { %1548 = vmatpush1.bf16.msra.mxu1 %v2941_v18  ;;  %v3071_v18 = vld [vmem:[#allocation7 + $0xc0] ss:$8 sps:$4 sm:$0xff]  }
  0xd7   :  { %1549 = vmatprep.subr.bf16.mxu1 %v2947_v19  ;;  %v3076_v19 = vld [vmem:[#allocation7 + $0xd4] ss:$8 sps:$4 sm:$0xff]  }
  0xda   :  { %2572 = vmatmul.mubr.msk.bf16.vlgmr.msra.gmra.mrb[0].mxu0 %vm1324_vm0, %v2944_v20  ;;  %1550 = vmatpush1.bf16.msra.mxu1 %v2945_v21  ;;  %v2996_v21 = vld [vmem:[#allocation5 + $0x488] ss:$16 sps:$4 sm:$0xff]  }
  0xdb   :  { %1630 = vmatpush1.bf16.msra.mxu0 %v3029_v22  ;;  %1551 = vmatprep.subr.bf16.mxu1 %v2950_v23  ;;  %v3001_v22 = vld [vmem:[#allocation5 + $0x4ac] ss:$16 sps:$4 sm:$0xff]   ;;  %v2999_v23 = vld [vmem:[#allocation5 + $0x4a8] ss:$16 sps:$4 sm:$0xff]  }
  0xdc   :  { %1661 = vmatprep.mubr.bf16.mxu0 %v3277_v16  ;;  %2080 = vmatprep.subr.bf16.mxu0 %v3037_v29  ;;  %v2990_v16 = vld [vmem:[#allocation5 + $0x448] ss:$16 sps:$4 sm:$0xff]   ;;  %v3079_v29 = vld [vmem:[#allocation7 + $0xe4] ss:$8 sps:$4 sm:$0xff]  }
  0xde   :  { %1552 = vmatpush1.bf16.msra.mxu1 %v2948_v4  ;;  %v3004_v4 = vld [vmem:[#allocation5 + $0x4cc] ss:$16 sps:$4 sm:$0xff]  }
  0xdf   :  { %1553 = vmatprep.subr.bf16.mxu1 %v2953_v24  ;;  %v3002_v24 = vld [vmem:[#allocation5 + $0x4c8] ss:$16 sps:$4 sm:$0xff]  }
  0xe2   :  { %2573 = vmatmul.mubr.msk.bf16.vlgmr.msra.gmra.mrb[4].mxu0 %vm1324_vm0, %v2944_v20  ;;  %1554 = vmatpush1.bf16.msra.mxu1 %v2951_v51  ;;  %v2998_v20 = vld [vmem:[#allocation5 + $0x48c] ss:$16 sps:$4 sm:$0xff]  }
  0xe3   :  { %1555 = vmatprep.subr.bf16.mxu1 %v2956_v25  ;;  %2081 = vmatpush1.bf16.msra.mxu0 %v3035_v28  ;;  %v3007_v51 = vld [vmem:[#allocation5 + $0x4ec] ss:$16 sps:$4 sm:$0xff]   ;;  %v3005_v25 = vld [vmem:[#allocation5 + $0x4e8] ss:$16 sps:$4 sm:$0xff]  }
  0xe4   :  { %2082 = vmatprep.subr.bf16.mxu0 %v3040_v30  ;;  %v3013_v28 = vld [vmem:[#allocation5 + $0x52c] ss:$16 sps:$4 sm:$0xff]   ;;  %v3011_v30 = vld [vmem:[#allocation5 + $0x528] ss:$16 sps:$4 sm:$0xff]  }
  0xe6   :  { %1556 = vmatpush1.bf16.msra.mxu1 %v2954_v26  ;;  %v3010_v26 = vld [vmem:[#allocation5 + $0x50c] ss:$16 sps:$4 sm:$0xff]  }
  0xe7   :  { %1557 = vmatprep.subr.bf16.mxu1 %v2959_v27  ;;  %2083 = vmatpush1.bf16.msra.mxu0 %v3038_v33  ;;  %v3008_v27 = vld [vmem:[#allocation5 + $0x508] ss:$16 sps:$4 sm:$0xff]   ;;  %v3082_v33 = vld [vmem:[#allocation7 + $0xf4] ss:$8 sps:$4 sm:$0xff]  }
  0xe8   :  { %2084 = vmatprep.subr.bf16.mxu0 %v3043_v35  ;;  %v3014_v35 = vld [vmem:[#allocation5 + $0x548] ss:$16 sps:$4 sm:$0xff]  }
  0xea   :  { %1558 = vmatpush1.bf16.msra.mxu1 %v2957_v31  ;;  %v3077_v31 = vld [vmem:[#allocation7 + $0xe0] ss:$8 sps:$4 sm:$0xff]  }
  0xeb   :  { %1559 = vmatprep.subr.bf16.mxu1 %v2962_v32  ;;  %2085 = vmatpush1.bf16.msra.mxu0 %v3041_v38  ;;  %v3016_v32 = vld [vmem:[#allocation5 + $0x54c] ss:$16 sps:$4 sm:$0xff]   ;;  %v3017_v38 = vld [vmem:[#allocation5 + $0x568] ss:$16 sps:$4 sm:$0xff]  }
  0xec   :  { %2086 = vmatprep.subr.bf16.mxu0 %v3046_v40  ;;  %v3085_v40 = vld [vmem:[#allocation7 + $0x104] ss:$8 sps:$4 sm:$0xff]  }
  0xee   :  { %1560 = vmatpush1.bf16.msra.mxu1 %v2960_v36  ;;  %v3080_v36 = vld [vmem:[#allocation7 + $0xf0] ss:$8 sps:$4 sm:$0xff]  }
  0xef   :  { %1561 = vmatprep.subr.bf16.mxu1 %v2965_v37  ;;  %2087 = vmatpush1.bf16.msra.mxu0 %v3044_v42  ;;  %v3019_v37 = vld [vmem:[#allocation5 + $0x56c] ss:$16 sps:$4 sm:$0xff]  }
  0xf0   :  { %2088 = vmatprep.subr.bf16.mxu0 %v3049_v43  ;;  %v3025_v42 = vld [vmem:[#allocation5 + $0x5ac] ss:$16 sps:$4 sm:$0xff]   ;;  %v3023_v43 = vld [vmem:[#allocation5 + $0x5a8] ss:$16 sps:$4 sm:$0xff]  }
  0xf2   :  { %1562 = vmatpush1.bf16.msra.mxu1 %v2963_v39  ;;  %v3022_v39 = vld [vmem:[#allocation5 + $0x58c] ss:$16 sps:$4 sm:$0xff]  }
  0xf3   :  { %1563 = vmatprep.subr.bf16.mxu1 %v2968_v41  ;;  %2089 = vmatpush1.bf16.msra.mxu0 %v3047_v46  ;;  %v3020_v41 = vld [vmem:[#allocation5 + $0x588] ss:$16 sps:$4 sm:$0xff]   ;;  %v3034_v46 = vld [vmem:[#allocation5 + $0x5ec] ss:$16 sps:$4 sm:$0xff]  }
  0xf4   :  { %2090 = vmatprep.subr.bf16.mxu0 %v3052_v47  ;;  %v3032_v47 = vld [vmem:[#allocation5 + $0x5e8] ss:$16 sps:$4 sm:$0xff]  }
  0xf6   :  { %1564 = vmatpush1.bf16.msra.mxu1 %v2966_v44  ;;  %v3028_v44 = vld [vmem:[#allocation5 + $0x5cc] ss:$16 sps:$4 sm:$0xff]  }
  0xf7   :  { %1565 = vmatprep.subr.bf16.mxu1 %v2971_v45  ;;  %2091 = vmatpush1.bf16.msra.mxu0 %v3050_v50  ;;  %v3026_v45 = vld [vmem:[#allocation5 + $0x5c8] ss:$16 sps:$4 sm:$0xff]  }
  0xf8   :  { %2092 = vmatprep.subr.bf16.mxu0 %v3055_v52 }
  0xfa   :  { %1566 = vmatpush1.bf16.msra.mxu1 %v2969_v48 }
  0xfb   :  { %1567 = vmatprep.subr.bf16.mxu1 %v2974_v49  ;;  %2093 = vmatpush1.bf16.msra.mxu0 %v3053_v55 }
  0xfc   :  { %2094 = vmatprep.subr.bf16.mxu0 %v3058_v56  ;;  %v3396_v56 = vld [vmem:[%s3448_s2] sm:$0xf] }
  0xfe   :  { %1568 = vmatpush1.bf16.msra.mxu1 %v2972_v53  ;;  %v289_v53 = vlaneseq }
  0xff   :  { %1569 = vmatprep.subr.bf16.mxu1 %v2977_v54  ;;  %2095 = vmatpush1.bf16.msra.mxu0 %v3056_v59 }
 0x100   :  { %2096 = vmatprep.subr.bf16.mxu0 %v3061_v60  ;;  %v3390_v54 = vshrl.u32 %v289_v53, 7  ;;  %v3119_v53 = vld [vmem:[#allocation7 + $0x1c0] ss:$8 sps:$4 sm:$0xff]  }
 0x102   :  { %1570 = vmatpush1.bf16.msra.mxu1 %v2975_v57  ;;  %v291_v55 = vsub.s32 0, %v3390_v54  ;;  %v295_v57 = vsub.s32 1, %v3390_v54 }
 0x103   :  { %1571 = vmatprep.subr.bf16.mxu1 %v2980_v58  ;;  %2097 = vmatpush1.bf16.msra.mxu0 %v3059_v63 }
 0x104   :  { %2098 = vmatprep.subr.bf16.mxu0 %v3064_v0  ;;  %v296_v58 = vrot.slane %v3396_v56, %v295_v57 }
 0x106   :  { %1572 = vmatpush1.bf16.msra.mxu1 %v2978_v61 }
 0x107   :  { %1573 = vmatprep.subr.bf16.mxu1 %v2983_v62  ;;  %2099 = vmatpush1.bf16.msra.mxu0 %v3062_v3  ;;  %v3133_v3 = vld [vmem:[#allocation8 + $0x48] sm:$0xff]  }
 0x108   :  { %2100 = vmatprep.subr.bf16.mxu0 %v3067_v6 }
 0x10a   :  { %1574 = vmatpush1.bf16.msra.mxu1 %v2981_v1  ;;  %v3131_v1 = vld [vmem:[#allocation8 + $0x40] sm:$0xff]  }
 0x10b   :  { %1586 = vmatprep.subr.bf16.mxu1 %v2986_v2  ;;  %2101 = vmatpush1.bf16.msra.mxu0 %v3065_v9  ;;  %v3132_v2 = vld [vmem:[#allocation8] sm:$0xff]  }
 0x10c   :  { %2102 = vmatprep.subr.bf16.mxu0 %v3070_v11 }
 0x10d   :  { %1576 = vmatmul.mubr.bf16.vlgmr.msra.gmra.mrb[4].mxu1 %v3375_v5  ;;  %v2993_v5 = vld [vmem:[#allocation5 + $0x468] ss:$16 sps:$4 sm:$0xff]  }
 0x10e   :  { %1587 = vmatpush1.bf16.msra.mxu1 %v2984_v7  ;;  %1618 = vmatprep.mubr.bf16.mxu1 %v3379_v34  ;;  %v3074_v34 = vld [vmem:[#allocation7 + $0xd0] ss:$8 sps:$4 sm:$0xff]  }
 0x10f   :  { %1588 = vmatprep.subr.bf16.mxu1 %v2989_v8  ;;  %2103 = vmatpush1.bf16.msra.mxu0 %v3068_v14 }
 0x110   :  { %2104 = vmatprep.subr.bf16.mxu0 %v3073_v15 }
 0x112   :  { %1589 = vmatpush1.bf16.msra.mxu1 %v2987_v12 }
 0x113   :  { %1590 = vmatprep.subr.bf16.mxu1 %v2992_v13  ;;  %2105 = vmatpush1.bf16.msra.mxu0 %v3071_v18  ;;  %v3134_v13 = vld [vmem:[#allocation8 + $0x8] sm:$0xff]  }
 0x114   :  { %2106 = vmatprep.subr.bf16.mxu0 %v3076_v19 }
 0x116   :  { %1591 = vmatpush1.bf16.msra.mxu1 %v2990_v16  ;;  %v3135_v16 = vld [vmem:[#allocation8 + $0x50] sm:$0xff]  }
 0x117   :  { %1592 = vmatprep.subr.bf16.mxu1 %v2995_v17  ;;  %2107 = vmatpush1.bf16.msra.mxu0 %v3074_v34 }
 0x118   :  { %2108 = vmatprep.subr.bf16.mxu0 %v3079_v29  ;;  %v3089_v29 = vld [vmem:[#allocation7 + $0x120] ss:$8 sps:$4 sm:$0xff]  }
 0x11a   :  { %1593 = vmatpush1.bf16.msra.mxu1 %v2993_v5 }
 0x11b   :  { %1594 = vmatprep.subr.bf16.mxu1 %v2998_v20  ;;  %2109 = vmatpush1.bf16.msra.mxu0 %v3077_v31  ;;  %v3083_v20 = vld [vmem:[#allocation7 + $0x100] ss:$8 sps:$4 sm:$0xff]   ;;  %v3094_v31 = vld [vmem:[#allocation7 + $0x134] ss:$8 sps:$4 sm:$0xff]  }
 0x11c   :  { %2110 = vmatprep.subr.bf16.mxu0 %v3082_v33  ;;  %v3092_v33 = vld [vmem:[#allocation7 + $0x130] ss:$8 sps:$4 sm:$0xff]  }
 0x11e   :  { %1595 = vmatpush1.bf16.msra.mxu1 %v2996_v21  ;;  %v3136_v21 = vld [vmem:[#allocation8 + $0x10] sm:$0xff]  }
 0x11f   :  { %1596 = vmatprep.subr.bf16.mxu1 %v3001_v22  ;;  %2111 = vmatpush1.bf16.msra.mxu0 %v3080_v36  ;;  %v3088_v22 = vld [vmem:[#allocation7 + $0x114] ss:$8 sps:$4 sm:$0xff]   ;;  %v3095_v36 = vld [vmem:[#allocation7 + $0x140] ss:$8 sps:$4 sm:$0xff]  }
 0x120   :  { %2123 = vmatprep.subr.bf16.mxu0 %v3085_v40  ;;  %v3101_v40 = vld [vmem:[#allocation7 + $0x160] ss:$8 sps:$4 sm:$0xff]  }
 0x122   :  { %1597 = vmatpush1.bf16.msra.mxu1 %v2999_v23 }
 0x123   :  { %1598 = vmatprep.subr.bf16.mxu1 %v3004_v4  ;;  %v3137_v4 = vld [vmem:[#allocation8 + $0x58] sm:$0xff]  }
 0x126   :  { %1599 = vmatpush1.bf16.msra.mxu1 %v3002_v24 }
 0x127   :  { %1600 = vmatprep.subr.bf16.mxu1 %v3007_v51 }
 0x12a   :  { %1601 = vmatpush1.bf16.msra.mxu1 %v3005_v25  ;;  %v3086_v25 = vld [vmem:[#allocation7 + $0x110] ss:$8 sps:$4 sm:$0xff]  }
 0x12b   :  { %1602 = vmatprep.subr.bf16.mxu1 %v3010_v26  ;;  %v3138_v26 = vld [vmem:[#allocation8 + $0x18] sm:$0xff]  }
 0x12e   :  { %1603 = vmatpush1.bf16.msra.mxu1 %v3008_v27  ;;  %v3091_v27 = vld [vmem:[#allocation7 + $0x124] ss:$8 sps:$4 sm:$0xff]  }
 0x12f   :  { %1604 = vmatprep.subr.bf16.mxu1 %v3013_v28  ;;  %v3139_v28 = vld [vmem:[#allocation8 + $0x60] sm:$0xff]  }
 0x132   :  { %1605 = vmatpush1.bf16.msra.mxu1 %v3011_v30  ;;  %v3140_v30 = vld [vmem:[#allocation8 + $0x20] sm:$0xff]  }
 0x133   :  { %1606 = vmatprep.subr.bf16.mxu1 %v3016_v32  ;;  %v3141_v32 = vld [vmem:[#allocation8 + $0x68] sm:$0xff]  }
 0x136   :  { %1607 = vmatpush1.bf16.msra.mxu1 %v3014_v35  ;;  %v3097_v35 = vld [vmem:[#allocation7 + $0x144] ss:$8 sps:$4 sm:$0xff]  }
 0x137   :  { %1608 = vmatprep.subr.bf16.mxu1 %v3019_v37  ;;  %v3100_v37 = vld [vmem:[#allocation7 + $0x154] ss:$8 sps:$4 sm:$0xff]  }
 0x13a   :  { %1609 = vmatpush1.bf16.msra.mxu1 %v3017_v38  ;;  %v3098_v38 = vld [vmem:[#allocation7 + $0x150] ss:$8 sps:$4 sm:$0xff]  }
 0x13b   :  { %1610 = vmatprep.subr.bf16.mxu1 %v3022_v39  ;;  %v3103_v39 = vld [vmem:[#allocation7 + $0x164] ss:$8 sps:$4 sm:$0xff]  }
 0x13e   :  { %1611 = vmatpush1.bf16.msra.mxu1 %v3020_v41  ;;  %v3106_v41 = vld [vmem:[#allocation7 + $0x174] ss:$8 sps:$4 sm:$0xff]  }
 0x13f   :  { %1612 = vmatprep.subr.bf16.mxu1 %v3025_v42  ;;  %v3104_v42 = vld [vmem:[#allocation7 + $0x170] ss:$8 sps:$4 sm:$0xff]  }
 0x142   :  { %1613 = vmatpush1.bf16.msra.mxu1 %v3023_v43  ;;  %v3109_v43 = vld [vmem:[#allocation7 + $0x184] ss:$8 sps:$4 sm:$0xff]  }
 0x143   :  { %1614 = vmatprep.subr.bf16.mxu1 %v3028_v44  ;;  %v3107_v44 = vld [vmem:[#allocation7 + $0x180] ss:$8 sps:$4 sm:$0xff]  }
 0x146   :  { %1615 = vmatpush1.bf16.msra.mxu1 %v3026_v45  ;;  %v3112_v45 = vld [vmem:[#allocation7 + $0x194] ss:$8 sps:$4 sm:$0xff]  }
 0x147   :  { %1616 = vmatprep.subr.bf16.mxu1 %v3034_v46  ;;  %v3110_v46 = vld [vmem:[#allocation7 + $0x190] ss:$8 sps:$4 sm:$0xff]  }
 0x14a   :  { %1617 = vmatpush1.bf16.msra.mxu1 %v3032_v47  ;;  %v3115_v47 = vld [vmem:[#allocation7 + $0x1a4] ss:$8 sps:$4 sm:$0xff]  }
 0x14b   :  { %2655 = vmatprep.subr.bf16.mxu1 %v3131_v1 }
 0x14d   :  { %1619 = vmatmul.mubr.bf16.vlgmr.msra.gmra.mrb[4].mxu1 %v3382_v10  ;;  %v292_v10 = vrot.slane %v3396_v56, %v291_v55 }
 0x14e   :  { %2656 = vmatpush3.bf16.msra.mxu1 %v3132_v2 }
 0x14f   :  { %2657 = vmatprep.subr.bf16.mxu1 %v3133_v3 }
 0x152   :  { %2658 = vmatpush3.bf16.msra.mxu1 %v3134_v13 }
 0x153   :  { %2659 = vmatprep.subr.bf16.mxu1 %v3135_v16 }
 0x156   :  { %2660 = vmatpush3.bf16.msra.mxu1 %v3136_v21 }
 0x157   :  { %2661 = vmatprep.subr.bf16.mxu1 %v3137_v4  ;;  %v3144_v4 = vld [vmem:[#allocation8 + $0x30] sm:$0xff]  }
 0x15a   :  { %2662 = vmatpush3.bf16.msra.mxu1 %v3138_v26 }
 0x15b   :  { %2663 = vmatprep.subr.bf16.mxu1 %v3139_v28 }
 0x15e   :  { %2664 = vmatpush3.bf16.msra.mxu1 %v3140_v30 }
 0x15f   :  { %2665 = vmatprep.subr.bf16.mxu1 %v3141_v32 }
 0x160   :  { %v1362_v48 = vpop.f32.mrb[0].mxu1 }
 0x161   :  { %v1364_v49 = vpop.f32.mrb[1].mxu1  ;;  %v1363_v59 = vadd.f32 %v1362_v48, %v292_v10  ;;  %v3113_v48 = vld [vmem:[#allocation7 + $0x1a0] ss:$8 sps:$4 sm:$0xff]  }
 0x162   :  { %v1366_v50 = vpop.f32.mrb[2].mxu1  ;;  %v1365_v60 = vadd.f32 %v1364_v49, %v296_v58  ;;  %v3118_v49 = vld [vmem:[#allocation7 + $0x1b4] ss:$8 sps:$4 sm:$0xff]  }
 0x163   :  { %v1368_v52 = vpop.f32.mrb[3].mxu1  ;;  %v1367_v62 = vadd.f32 %v1366_v50, %v292_v10  ;;  %v3116_v50 = vld [vmem:[#allocation7 + $0x1b0] ss:$8 sps:$4 sm:$0xff]   ;;  %v3124_v10 = vld [vmem:[#allocation7 + $0x1d4] ss:$8 sps:$4 sm:$0xff]  }
 0x164   :  { %v1369_v6 = vadd.f32 %v1368_v52, %v296_v58  ;;  %v3121_v52 = vld [vmem:[#allocation7 + $0x1c4] ss:$8 sps:$4 sm:$0xff]   ;;  %v3122_v58 = vld [vmem:[#allocation7 + $0x1d0] ss:$8 sps:$4 sm:$0xff]  }
 0x1ad   :  { %v1491_v61 = vpop.f32.mrb[0].mxu0 }
 0x1ae   :  { %v2678_v63 = vadd.f32 %v1491_v61, %v1363_v59  ;;  %v1493_v0 = vpop.f32.mrb[1].mxu0  ;;  %v3127_v59 = vld [vmem:[#allocation7 + $0x1e4] ss:$8 sps:$4 sm:$0xff]   ;;  %v3130_v61 = vld [vmem:[#allocation7 + $0x1f4] ss:$8 sps:$4 sm:$0xff]  }
 0x1af   :  { %v2680_v7 = vadd.f32 %v1493_v0, %v1365_v60  ;;  %v1495_v8 = vpop.f32.mrb[2].mxu0  ;;  %v3125_v60 = vld [vmem:[#allocation7 + $0x1e0] ss:$8 sps:$4 sm:$0xff]   ;;  %v303_v0 = vsub.s32 3, %v3390_v54 }
 0x1b0   :  { %v2682_v9 = vadd.f32 %v1495_v8, %v1367_v62  ;;  %v1497_v11 = vpop.f32.mrb[3].mxu0  ;;  %v1672_v14 = vmax.f32 %v2678_v63, 0.0  ;;  %v3128_v62 = vld [vmem:[#allocation7 + $0x1f0] ss:$8 sps:$4 sm:$0xff]   ;;  %v299_v63 = vsub.s32 2, %v3390_v54 }
 0x1b1   :  { %v2684_v12 = vadd.f32 %v1497_v11, %v1369_v6  ;;  %v1673_v17 = vmax.f32 %v2680_v7, 0.0  ;;  %v304_v2 = vrot.slane %v3396_v56, %v303_v0  ;;  %v2638_v54 = vld [vmem:[%s3452_s6] ss:$0 sm:$0xff] }
 0x1b2   :  { %v1676_v15 = vmax.f32 %v2682_v9, 0.0  ;;  %v300_v1 = vrot.slane %v3396_v56, %v299_v63 }
 0x1b3   :  { %v1677_v18 = vmax.f32 %v2684_v12, 0.0 }
 0x1b4   :  { %v1680_v19 = vpack.c.bf16 %v1676_v15, %v1672_v14 }
 0x1b5   :  { %v1681_v5 = vpack.c.bf16 %v1677_v18, %v1673_v17  ;;  %v3405_v34 = vpop.f32.mrb[4].mxu0 }
 0x1b6   :  { %v3407_v23 = vpop.f32.mrb[5].mxu0 }
 0x1b7   :  { %2112 = vmatprep.mubr.bf16.mxu0 %v1681_v5  ;;  %v3409_v24 = vpop.f32.mrb[6].mxu0 }
 0x1b8   :  { %2113 = vmatmul.mubr.bf16.vlgmr.msra.gmra.mrb[8].mxu0 %v1680_v19  ;;  %v3411_v51 = vpop.f32.mrb[7].mxu0 }
 0x1b9   :  { %2124 = vmatpush1.bf16.msra.mxu0 %v3083_v20 }
 0x1ba   :  { %2125 = vmatprep.subr.bf16.mxu0 %v3088_v22  ;;  %v3142_v22 = vld [vmem:[#allocation8 + $0x28] sm:$0xff]  }
 0x1bb   :  { %2666 = vmatpush3.bf16.msra.mxu1 %v3142_v22 }
 0x1bd   :  { %2126 = vmatpush1.bf16.msra.mxu0 %v3086_v25  ;;  %v3146_v25 = vld [vmem:[#allocation8 + $0x38] sm:$0xff]  }
 0x1be   :  { %2127 = vmatprep.subr.bf16.mxu0 %v3091_v27 }
 0x1c1   :  { %2128 = vmatpush1.bf16.msra.mxu0 %v3089_v29 }
 0x1c2   :  { %2129 = vmatprep.subr.bf16.mxu0 %v3094_v31 }
 0x1c5   :  { %2130 = vmatpush1.bf16.msra.mxu0 %v3092_v33 }
 0x1c6   :  { %2131 = vmatprep.subr.bf16.mxu0 %v3097_v35 }
 0x1c9   :  { %2132 = vmatpush1.bf16.msra.mxu0 %v3095_v36 }
 0x1ca   :  { %2133 = vmatprep.subr.bf16.mxu0 %v3100_v37 }
 0x1cd   :  { %2134 = vmatpush1.bf16.msra.mxu0 %v3098_v38 }
 0x1ce   :  { %2135 = vmatprep.subr.bf16.mxu0 %v3103_v39 }
 0x1d1   :  { %2136 = vmatpush1.bf16.msra.mxu0 %v3101_v40 }
 0x1d2   :  { %2137 = vmatprep.subr.bf16.mxu0 %v3106_v41 }
 0x1d5   :  { %2138 = vmatpush1.bf16.msra.mxu0 %v3104_v42 }
 0x1d6   :  { %2139 = vmatprep.subr.bf16.mxu0 %v3109_v43 }
 0x1d9   :  { %2140 = vmatpush1.bf16.msra.mxu0 %v3107_v44 }
 0x1da   :  { %2141 = vmatprep.subr.bf16.mxu0 %v3112_v45 }
 0x1dd   :  { %2142 = vmatpush1.bf16.msra.mxu0 %v3110_v46 }
 0x1de   :  { %2143 = vmatprep.subr.bf16.mxu0 %v3115_v47 }
 0x1e1   :  { %2144 = vmatpush1.bf16.msra.mxu0 %v3113_v48 }
 0x1e2   :  { %2145 = vmatprep.subr.bf16.mxu0 %v3118_v49 }
 0x1e5   :  { %2146 = vmatpush1.bf16.msra.mxu0 %v3116_v50 }
 0x1e6   :  { %2147 = vmatprep.subr.bf16.mxu0 %v3121_v52 }
 0x1e9   :  { %2148 = vmatpush1.bf16.msra.mxu0 %v3119_v53 }
 0x1ea   :  { %2149 = vmatprep.subr.bf16.mxu0 %v3124_v10 }
 0x1ed   :  { %2150 = vmatpush1.bf16.msra.mxu0 %v3122_v58 }
 0x1ee   :  { %2151 = vmatprep.subr.bf16.mxu0 %v3127_v59 }
 0x1f1   :  { %2152 = vmatpush1.bf16.msra.mxu0 %v3125_v60 }
 0x1f2   :  { %2153 = vmatprep.subr.bf16.mxu0 %v3130_v61 }
 0x1f5   :  { %2154 = vmatpush1.bf16.msra.mxu0 %v3128_v62 }
 0x220   :  { %v1620_v3 = vpop.f32.mrb[4].mxu1 }
 0x221   :  { %v2685_v6 = vadd.f32 %v1620_v3, %v300_v1  ;;  %v1622_v7 = vpop.f32.mrb[5].mxu1 }
 0x222   :  { %v2687_v8 = vadd.f32 %v1622_v7, %v304_v2  ;;  %v1624_v9 = vpop.f32.mrb[6].mxu1 }
 0x223   :  { %v2686_v11 = vadd.f32 %v2685_v6, %v3405_v34  ;;  %v2689_v12 = vadd.f32 %v1624_v9, %v300_v1  ;;  %v1626_v13 = vpop.f32.mrb[7].mxu1  ;;  %v3143_v34 = vld [vmem:[#allocation8 + $0x70] sm:$0xff]  }
 0x224   :  { %v2688_v14 = vadd.f32 %v2687_v8, %v3407_v23  ;;  %v2691_v15 = vadd.f32 %v1626_v13, %v304_v2  ;;  %2667 = vmatprep.subr.bf16.mxu1 %v3143_v34  ;;  %v3145_v23 = vld [vmem:[#allocation8 + $0x78] sm:$0xff]  }
 0x225   :  { %v2690_v16 = vadd.f32 %v2689_v12, %v3409_v24  ;;  %v1674_v18 = vmax.f32 %v2686_v11, 0.0  ;;  %2668 = vmatpush3.bf16.msra.mxu1 %v3144_v4  ;;  %v1748_v24 = vld [vmem:[%s3450_s4] sm:$0x3] }
 0x226   :  { %v2692_v17 = vadd.f32 %v2691_v15, %v3411_v51  ;;  %v1675_v5 = vmax.f32 %v2688_v14, 0.0  ;;  %2669 = vmatprep.subr.bf16.mxu1 %v3145_v23  ;;  %v1753_v51 = vrot.slane %v1748_v24, %v291_v55  ;;  %v1757_v26 = vrot.slane %v1748_v24, %v295_v57 }
 0x227   :  { %v1678_v19 = vmax.f32 %v2690_v16, 0.0 }
 0x228   :  { %v1679_v56 = vmax.f32 %v2692_v17, 0.0 }
 0x229   :  { %v1682_v20 = vpack.c.bf16 %v1678_v19, %v1674_v18  ;;  %2670 = vmatpush3.bf16.msra.mxu1 %v3146_v25 }
 0x22a   :  { %v1683_v21 = vpack.c.bf16 %v1679_v56, %v1675_v5 }
 0x22c   :  { %2155 = vmatprep.mubr.bf16.mxu0 %v1683_v21 }
 0x22d   :  { %2156 = vmatmul.mubr.bf16.vlgmr.msra.gmra.mrb[8].mxu0 %v1682_v20 }
 0x300   :  { %v2157_v27 = vpop.f32.mrb[8].mxu0 }
 0x301   :  { %v2693_v28 = vadd.f32 %v2157_v27, %v1753_v51  ;;  %v2159_v29 = vpop.f32.mrb[9].mxu0 }
 0x302   :  { %v2694_v30 = vadd.f32 %v2159_v29, %v1757_v26  ;;  %v2161_v31 = vpop.f32.mrb[10].mxu0 }
 0x303   :  { %v2695_v32 = vadd.f32 %v2161_v31, %v1753_v51  ;;  %v2163_v33 = vpop.f32.mrb[11].mxu0  ;;  %v2166_v36 = vmax.f32 %v2693_v28, 0.0 }
 0x304   :  { %v2696_v35 = vadd.f32 %v2163_v33, %v1757_v26  ;;  %v2167_v38 = vmax.f32 %v2694_v30, 0.0 }
 0x305   :  { %v2168_v37 = vmax.f32 %v2695_v32, 0.0 }
 0x306   :  { %v2169_v39 = vmax.f32 %v2696_v35, 0.0 }
 0x307   :  { %v2170_v40 = vpack.c.bf16 %v2168_v37, %v2166_v36 }
 0x308   :  { %v2171_v41 = vpack.c.bf16 %v2169_v39, %v2167_v38 }
 0x30a   :  { %2339 = vmatprep.mubr.bf16.mxu1 %v2171_v41 }
 0x30b   :  { %2340 = vmatmul.mubr.bf16.vlgmr.msra.gmra.mrb[8].mxu1 %v2170_v40 }
 0x3de   :  { %v2671_v55 = vpop.f32.mrb[8].mxu1 }
 0x3df   :  { %v2672_v57 = vpop.f32.mrb[9].mxu1 }
 0x3e0   :  { %v2673_v42 = vadd.f32 %v2672_v57, %v2671_v55  ;;  %v2674_v43 = vpop.f32.mrb[10].mxu1 }
 0x3e1   :  { %v2675_v44 = vpop.f32.mrb[11].mxu1 }
 0x3e2   :  { %v2342_v45 = vadd.f32 %v2673_v42, %v2638_v54  ;;  %v2676_v46 = vadd.f32 %v2675_v44, %v2674_v43 }
 0x3e4   :  { %2348 = vst [vmem:[#allocation10] sm:$0xff] %v2342_v45  ;;  %v2345_v47 = vadd.f32 %v2676_v46, %v2638_v54 }
 0x3e6   :  { %2349 = vst [vmem:[#allocation10 + $0x8] sm:$0xff] %v2345_v47 }
 0x3e7   :  { %3246 = shalt.err (!%p3243_p8)
}
 0x3e8   :  { %s3247_s14 = scalar_lea.hbm %s3453_s7, 256 }
 0x3e9   :  { %p3248_p9 = scmp.ne.s32.totalorder %s3453_s7, %s3247_s14  ;;  %p3251_p10 = scmp.lt.u32.totalorder %s3247_s14, %s3453_s7 }
 0x3eb   :  { %p3253_p11 = pnand %p3251_p10, %p3248_p9 }
 0x3ed   :  { %3256 = shalt.err (!%p3253_p11)
}
 0x3ee   :  { %2361 = dma.vmem_to_hbm [thread:$0]  %s2356_s11, 256, %s3453_s7, [#allocation4], %s3272_s0, %s3272_s0, %s3273_s15  }
 0x3ef   :  { %3263 = dma.done.wait [#allocation4], 256  }
 0x3f0   :  { %3264 = vsyncadd [#allocation4], 4294967040 }
 0x3f1   :  { %2365 = vsyncpa [#allocation3], 1 }
 0x3f2   :  { %2366 = vsyncpa [#allocation6], 1 }
 0x3f3   :  { %2367 = vsyncpa [#allocation9], 1 }
 0x3f4   :  { %2368 = vsyncpa [#allocation4], 1 }

</bundles_post_ra>
